<compile_context>
chip_gen: v7x
topology: tpu7x:2x2x1
jax: 0.10.0
libtpu: 0.0.40
codegen_flags: <defaults>
</compile_context>

<pallas_src>
from functools import partial

import jax
import jax.numpy as jnp
from jax.experimental import pallas as pl
from jax.experimental.pallas import tpu as pltpu


def _round_up(x, m):
    return ((x + m - 1) // m) * m


def _choose_tb(B):
    """Batch tile: big enough to amortize per-grid-step overhead (~0.35us),
    small enough to leave >=2 grid steps for large B so the parallel batch
    axis can shard across TensorCores."""
    if B <= 256:
        return _round_up(max(B, 8), 8)
    if B <= 1024:
        return 256
    return 512


def convkb_kernel(h_ref, r_ref, t_ref, w_ref, b_ref, fcw_ref, fcb_ref, out_ref):
    """Fused ConvKB: (1,3) conv + ReLU + fc reduction for one batch tile.

    h_ref, r_ref, t_ref : (tb, Dp) VMEM  gathered embeddings (D zero-padded)
    w_ref               : (C, 3)   SMEM  conv weights (out_channel, kernel pos)
    b_ref               : (C,)     SMEM  conv bias
    fcw_ref             : (C, Dp)  VMEM  fc weight, channel-major, zero-padded
    fcb_ref             : (1,)     SMEM  fc bias
    out_ref             : (tb, 1)  VMEM  scores for this tile
    """
    h = h_ref[...]
    r = r_ref[...]
    t = t_ref[...]

    C = fcw_ref.shape[0]
    acc = jnp.zeros(h.shape, jnp.float32)

    # Channel loop, fully unrolled at trace time (C is a small static int).
    # Each iteration is a handful of scalar*vector FMAs on a (tb, Dp) slab;
    # conv weights/bias come from SMEM scalars so there is no lane broadcast
    # and no (tb, C, Dp) intermediate.
    for c in range(C):
        conv_c = (w_ref[c, 0] * h
                  + w_ref[c, 1] * r
                  + w_ref[c, 2] * t
                  + b_ref[c])
        conv_c = jnp.maximum(conv_c, 0.0)          # ReLU
        # TODO(synk): drop_conv dropout is identity (eval mode) -- no RNG here.
        acc = acc + conv_c * fcw_ref[c, :]         # fused fc contribution

    # Single cross-lane (XLU) reduction per tile; padded D lanes contribute 0
    # because fc_w is zero-padded there. keepdims keeps the natural (tb, 1)
    # layout so the store needs no relayout.
    scores = jnp.sum(acc, axis=-1, keepdims=True) + fcb_ref[0]   # (tb, 1)
    out_ref[...] = scores.astype(out_ref.dtype)


def convkb_forward(h, r, t, conv_w, conv_b, fc_w, fc_b, *, tb):
    """h, r, t: (B, Dp) f32 with B % tb == 0; conv_w: (C, 3); conv_b: (C,);
    fc_w: (C, Dp) zero-padded; fc_b: (1,). Returns (B, 1) float32."""
    B, Dp = h.shape
    C = fc_w.shape[0]
    assert B % tb == 0, "caller must pad the batch to a multiple of tb"
    assert tb % 8 == 0 and Dp % 128 == 0
    grid = (B // tb,)

    tile = pl.BlockSpec((tb, Dp), lambda i: (i, 0))
    smem = pl.BlockSpec(memory_space=pltpu.MemorySpace.SMEM)

    return pl.pallas_call(
        convkb_kernel,
        out_shape=jax.ShapeDtypeStruct((B, 1), jnp.float32),
        grid=grid,
        in_specs=[
            tile,                                      # h
            tile,                                      # r
            tile,                                      # t
            smem,                                      # conv weight (C, 3)
            smem,                                      # conv bias   (C,)
            pl.BlockSpec((C, Dp), lambda i: (0, 0)),   # fc weight, resident
            smem,                                      # fc bias     (1,)
        ],
        # (tb, 1) block: last dim equals the full array dim, sublane dim is a
        # multiple of 8 -> legal for any tile count; store cost is negligible
        # vs. the 3x(tb, Dp) input traffic.
        out_specs=pl.BlockSpec((tb, 1), lambda i: (i, 0)),
        compiler_params=pltpu.CompilerParams(
            dimension_semantics=("parallel",),          # megacore-shardable batch
            vmem_limit_bytes=32 * 1024 * 1024),         # safe on v5e/v6e/v7x
    )(h, r, t, conv_w, conv_b, fc_w, fc_b)


@partial(jax.jit, static_argnames=("tb",))
def _gather_and_score(ent_pad, rel_pad, conv_w, conv_b, fcw_pad, fc_b, idx, tb):
    # TODO(synk): the embedding gather stays in XLA; fusing it into the kernel
    # (PrefetchScalarGridSpec + per-row DMA from the HBM tables) would roughly
    # halve HBM traffic but is not implemented here.
    h = ent_pad[idx[:, 0], :]
    r = rel_pad[idx[:, 1], :]
    t = ent_pad[idx[:, 2], :]
    return convkb_forward(h, r, t, conv_w, conv_b, fcw_pad, fc_b, tb=tb)


class SpKBGATConvOnlyPallas:
    """JAX/Pallas re-implementation of SpKBGATConvOnly (forward only)."""

    def __init__(self, key, num_nodes, num_relation, entity_out_dim,
                 nheads_GAT, conv_out_channels):
        D = entity_out_dim[0] * nheads_GAT[0]
        C = conv_out_channels
        k0, k1, k2, k3, k4, k5 = jax.random.split(key, 6)

        # nn.Parameter(torch.randn(...))
        self.final_entity_embeddings = jax.random.normal(
            k0, (num_nodes, D), dtype=jnp.float32)
        self.final_relation_embeddings = jax.random.normal(
            k1, (num_relation, D), dtype=jnp.float32)

        # ConvKB(D, 3, 1, C, ...): Conv2d(1, C, (1, 3)) + Linear(C*D, 1)
        # PyTorch conv weight (C, 1, 1, 3) -> stored as (C, 3); bias (C,)
        self.conv_w = (jax.random.normal(k2, (C, 3), dtype=jnp.float32)
                       * (1.0 / jnp.sqrt(3.0)))
        self.conv_b = jax.random.normal(k3, (C,), dtype=jnp.float32) * 0.01
        # PyTorch fc weight (1, C*D); the (B, C, D) flatten is channel-major,
        # so keep it as (C, D). fc bias as (1,).
        self.fc_w = (jax.random.normal(k4, (C, D), dtype=jnp.float32)
                     * (1.0 / jnp.sqrt(C * D)))
        self.fc_b = jax.random.normal(k5, (1,), dtype=jnp.float32) * 0.01

        self.D, self.C = D, C
        # Lane-dense copies: pad D to a multiple of 128. fc_w is zero-padded,
        # so padded lanes contribute exactly zero to the scores.
        self.Dp = max(128, _round_up(D, 128))
        pad = self.Dp - D
        self._ent_pad = jnp.pad(self.final_entity_embeddings, ((0, 0), (0, pad)))
        self._rel_pad = jnp.pad(self.final_relation_embeddings, ((0, 0), (0, pad)))
        self._fcw_pad = jnp.pad(self.fc_w, ((0, 0), (0, pad)))

    def forward(self, batch_inputs, *, tb=None):
        # batch_inputs: (B, 3) int32 triples [head, relation, tail]
        # (Corpus_ / adj args of the original forward are unused there.)
        B = batch_inputs.shape[0]
        if tb is None:
            tb = _choose_tb(B)
        Bp = _round_up(B, tb)

        idx = batch_inputs
        if Bp != B:
            # Pad ragged batches with dummy (index 0) triples; their scores
            # are computed and sliced off below.
            idx = jnp.concatenate(
                [idx, jnp.zeros((Bp - B, 3), dtype=idx.dtype)], axis=0)

        out = _gather_and_score(self._ent_pad, self._rel_pad, self.conv_w,
                                self.conv_b, self._fcw_pad, self.fc_b,
                                idx, tb)
        return out[:B]


def _reference_forward(model, batch_inputs):
    """Pure-JAX reference matching the PyTorch ConvKB math (eval mode)."""
    h = model.final_entity_embeddings[batch_inputs[:, 0], :]
    r = model.final_relation_embeddings[batch_inputs[:, 1], :]
    t = model.final_entity_embeddings[batch_inputs[:, 2], :]
    conv = (h[:, None, :] * model.conv_w[None, :, 0:1]
            + r[:, None, :] * model.conv_w[None, :, 1:2]
            + t[:, None, :] * model.conv_w[None, :, 2:3]
            + model.conv_b[None, :, None])
    conv = jnp.maximum(conv, 0.0)
    flat = conv.reshape(conv.shape[0], -1)            # (B, C*D), channel-major
    return flat @ model.fc_w.reshape(-1, 1) + model.fc_b[0]


if __name__ == "__main__":
    key = jax.random.PRNGKey(0)
    k_model, k_idx = jax.random.split(key)

    num_nodes, num_relation = 32, 8
    entity_out_dim = [16, 16]
    nheads_GAT = [2, 2]
    conv_out_channels = 4

    model = SpKBGATConvOnlyPallas(k_model, num_nodes, num_relation,
                                  entity_out_dim, nheads_GAT,
                                  conv_out_channels)

    def make_batch(k, B):
        kh, kr, kt = jax.random.split(k, 3)
        heads = jax.random.randint(kh, (B,), 0, num_nodes)
        rels = jax.random.randint(kr, (B,), 0, num_relation)
        tails = jax.random.randint(kt, (B,), 0, num_nodes)
        return jnp.stack([heads, rels, tails], axis=1).astype(jnp.int32)

    # Case 1: small batch, single tile (block == full array).
    B1 = 16
    batch1 = make_batch(k_idx, B1)
    out1 = jax.block_until_ready(model.forward(batch1))
    ref1 = _reference_forward(model, batch1)
    assert out1.shape == (B1, 1)
    assert jnp.allclose(out1, ref1, atol=1e-3, rtol=1e-3), (out1, ref1)

    # Case 2: multi-tile grid (exercises the tiled output path) with a ragged
    # batch that gets padded internally.
    B2 = 44
    batch2 = make_batch(jax.random.fold_in(k_idx, 1), B2)
    out2 = jax.block_until_ready(model.forward(batch2, tb=16))
    ref2 = _reference_forward(model, batch2)
    assert out2.shape == (B2, 1)
    assert jnp.allclose(out2, ref2, atol=1e-3, rtol=1e-3), (out2, ref2)

    print("KERNEL_OK")
</pallas_src>

<mosaic_0001>
module attributes {stable_mosaic.version = 11 : i64} {
  func.func @convkb_kernel(%arg0: i32, %arg1: memref<16x128xf32, #tpu.memory_space<vmem>>, %arg2: memref<16x128xf32, #tpu.memory_space<vmem>>, %arg3: memref<16x128xf32, #tpu.memory_space<vmem>>, %arg4: memref<4x3xf32, #tpu.memory_space<smem>>, %arg5: memref<4xf32, #tpu.memory_space<smem>>, %arg6: memref<4x128xf32, #tpu.memory_space<vmem>>, %arg7: memref<1xf32, #tpu.memory_space<smem>>, %arg8: memref<16x1xf32, #tpu.memory_space<vmem>>) attributes {dimension_semantics = [#tpu.dimension_semantics<parallel>], iteration_bounds = array<i64: 1>, scalar_prefetch = 0 : i64, scratch_operands = 0 : i64, tpu.core_type = #tpu.core_type<tc>, window_params = [{transform_indices = @transform_0, window_bounds = array<i64: 16, 128>}, {transform_indices = @transform_1, window_bounds = array<i64: 16, 128>}, {transform_indices = @transform_2, window_bounds = array<i64: 16, 128>}, {transform_indices = @transform_3, window_bounds = array<i64: 4, 3>}, {transform_indices = @transform_4, window_bounds = array<i64: 4>}, {pipeline_mode = #tpu.pipeline_mode<synchronous>, transform_indices = @transform_5, window_bounds = array<i64: 4, 128>}, {transform_indices = @transform_6, window_bounds = array<i64: 1>}, {transform_indices = @transform_7, window_bounds = array<i64: 16, 1>}]} {
    %c0 = arith.constant 0 : index
    %c0_0 = arith.constant 0 : index
    %0 = vector.load %arg1[%c0, %c0_0] : memref<16x128xf32, #tpu.memory_space<vmem>>, vector<16x128xf32>
    %c0_1 = arith.constant 0 : index
    %c0_2 = arith.constant 0 : index
    %1 = vector.load %arg2[%c0_1, %c0_2] : memref<16x128xf32, #tpu.memory_space<vmem>>, vector<16x128xf32>
    %c0_3 = arith.constant 0 : index
    %c0_4 = arith.constant 0 : index
    %2 = vector.load %arg3[%c0_3, %c0_4] : memref<16x128xf32, #tpu.memory_space<vmem>>, vector<16x128xf32>
    %cst = arith.constant 0.000000e+00 : f32
    %3 = vector.broadcast %cst : f32 to vector<16x128xf32>
    %c0_5 = arith.constant 0 : index
    %c0_6 = arith.constant 0 : index
    %4 = memref.load %arg4[%c0_5, %c0_6] : memref<4x3xf32, #tpu.memory_space<smem>>
    %5 = vector.broadcast %4 : f32 to vector<16x128xf32>
    %6 = arith.mulf %5, %0 : vector<16x128xf32>
    %c0_7 = arith.constant 0 : index
    %c1 = arith.constant 1 : index
    %7 = memref.load %arg4[%c0_7, %c1] : memref<4x3xf32, #tpu.memory_space<smem>>
    %8 = vector.broadcast %7 : f32 to vector<16x128xf32>
    %9 = arith.mulf %8, %1 : vector<16x128xf32>
    %10 = arith.addf %6, %9 : vector<16x128xf32>
    %c0_8 = arith.constant 0 : index
    %c2 = arith.constant 2 : index
    %11 = memref.load %arg4[%c0_8, %c2] : memref<4x3xf32, #tpu.memory_space<smem>>
    %12 = vector.broadcast %11 : f32 to vector<16x128xf32>
    %13 = arith.mulf %12, %2 : vector<16x128xf32>
    %14 = arith.addf %10, %13 : vector<16x128xf32>
    %c0_9 = arith.constant 0 : index
    %15 = memref.load %arg5[%c0_9] : memref<4xf32, #tpu.memory_space<smem>>
    %16 = vector.broadcast %15 : f32 to vector<16x128xf32>
    %17 = arith.addf %14, %16 : vector<16x128xf32>
    %cst_10 = arith.constant 0.000000e+00 : f32
    %18 = vector.broadcast %cst_10 : f32 to vector<16x128xf32>
    %19 = arith.maximumf %17, %18 : vector<16x128xf32>
    %c0_11 = arith.constant 0 : index
    %c0_12 = arith.constant 0 : index
    %20 = vector.load %arg6[%c0_11, %c0_12] : memref<4x128xf32, #tpu.memory_space<vmem>>, vector<1x128xf32>
    %21 = vector.shape_cast %20 : vector<1x128xf32> to vector<128xf32>
    %22 = vector.shape_cast %21 : vector<128xf32> to vector<1x128xf32>
    %23 = vector.broadcast %22 : vector<1x128xf32> to vector<16x128xf32>
    %24 = arith.mulf %19, %23 : vector<16x128xf32>
    %25 = arith.addf %3, %24 : vector<16x128xf32>
    %c1_13 = arith.constant 1 : index
    %c0_14 = arith.constant 0 : index
    %26 = memref.load %arg4[%c1_13, %c0_14] : memref<4x3xf32, #tpu.memory_space<smem>>
    %27 = vector.broadcast %26 : f32 to vector<16x128xf32>
    %28 = arith.mulf %27, %0 : vector<16x128xf32>
    %c1_15 = arith.constant 1 : index
    %c1_16 = arith.constant 1 : index
    %29 = memref.load %arg4[%c1_15, %c1_16] : memref<4x3xf32, #tpu.memory_space<smem>>
    %30 = vector.broadcast %29 : f32 to vector<16x128xf32>
    %31 = arith.mulf %30, %1 : vector<16x128xf32>
    %32 = arith.addf %28, %31 : vector<16x128xf32>
    %c1_17 = arith.constant 1 : index
    %c2_18 = arith.constant 2 : index
    %33 = memref.load %arg4[%c1_17, %c2_18] : memref<4x3xf32, #tpu.memory_space<smem>>
    %34 = vector.broadcast %33 : f32 to vector<16x128xf32>
    %35 = arith.mulf %34, %2 : vector<16x128xf32>
    %36 = arith.addf %32, %35 : vector<16x128xf32>
    %c1_19 = arith.constant 1 : index
    %37 = memref.load %arg5[%c1_19] : memref<4xf32, #tpu.memory_space<smem>>
    %38 = vector.broadcast %37 : f32 to vector<16x128xf32>
    %39 = arith.addf %36, %38 : vector<16x128xf32>
    %cst_20 = arith.constant 0.000000e+00 : f32
    %40 = vector.broadcast %cst_20 : f32 to vector<16x128xf32>
    %41 = arith.maximumf %39, %40 : vector<16x128xf32>
    %c1_21 = arith.constant 1 : index
    %c0_22 = arith.constant 0 : index
    %42 = vector.load %arg6[%c1_21, %c0_22] : memref<4x128xf32, #tpu.memory_space<vmem>>, vector<1x128xf32>
    %43 = vector.shape_cast %42 : vector<1x128xf32> to vector<128xf32>
    %44 = vector.shape_cast %43 : vector<128xf32> to vector<1x128xf32>
    %45 = vector.broadcast %44 : vector<1x128xf32> to vector<16x128xf32>
    %46 = arith.mulf %41, %45 : vector<16x128xf32>
    %47 = arith.addf %25, %46 : vector<16x128xf32>
    %c2_23 = arith.constant 2 : index
    %c0_24 = arith.constant 0 : index
    %48 = memref.load %arg4[%c2_23, %c0_24] : memref<4x3xf32, #tpu.memory_space<smem>>
    %49 = vector.broadcast %48 : f32 to vector<16x128xf32>
    %50 = arith.mulf %49, %0 : vector<16x128xf32>
    %c2_25 = arith.constant 2 : index
    %c1_26 = arith.constant 1 : index
    %51 = memref.load %arg4[%c2_25, %c1_26] : memref<4x3xf32, #tpu.memory_space<smem>>
    %52 = vector.broadcast %51 : f32 to vector<16x128xf32>
    %53 = arith.mulf %52, %1 : vector<16x128xf32>
    %54 = arith.addf %50, %53 : vector<16x128xf32>
    %c2_27 = arith.constant 2 : index
    %c2_28 = arith.constant 2 : index
    %55 = memref.load %arg4[%c2_27, %c2_28] : memref<4x3xf32, #tpu.memory_space<smem>>
    %56 = vector.broadcast %55 : f32 to vector<16x128xf32>
    %57 = arith.mulf %56, %2 : vector<16x128xf32>
    %58 = arith.addf %54, %57 : vector<16x128xf32>
    %c2_29 = arith.constant 2 : index
    %59 = memref.load %arg5[%c2_29] : memref<4xf32, #tpu.memory_space<smem>>
    %60 = vector.broadcast %59 : f32 to vector<16x128xf32>
    %61 = arith.addf %58, %60 : vector<16x128xf32>
    %cst_30 = arith.constant 0.000000e+00 : f32
    %62 = vector.broadcast %cst_30 : f32 to vector<16x128xf32>
    %63 = arith.maximumf %61, %62 : vector<16x128xf32>
    %c2_31 = arith.constant 2 : index
    %c0_32 = arith.constant 0 : index
    %64 = vector.load %arg6[%c2_31, %c0_32] : memref<4x128xf32, #tpu.memory_space<vmem>>, vector<1x128xf32>
    %65 = vector.shape_cast %64 : vector<1x128xf32> to vector<128xf32>
    %66 = vector.shape_cast %65 : vector<128xf32> to vector<1x128xf32>
    %67 = vector.broadcast %66 : vector<1x128xf32> to vector<16x128xf32>
    %68 = arith.mulf %63, %67 : vector<16x128xf32>
    %69 = arith.addf %47, %68 : vector<16x128xf32>
    %c3 = arith.constant 3 : index
    %c0_33 = arith.constant 0 : index
    %70 = memref.load %arg4[%c3, %c0_33] : memref<4x3xf32, #tpu.memory_space<smem>>
    %71 = vector.broadcast %70 : f32 to vector<16x128xf32>
    %72 = arith.mulf %71, %0 : vector<16x128xf32>
    %c3_34 = arith.constant 3 : index
    %c1_35 = arith.constant 1 : index
    %73 = memref.load %arg4[%c3_34, %c1_35] : memref<4x3xf32, #tpu.memory_space<smem>>
    %74 = vector.broadcast %73 : f32 to vector<16x128xf32>
    %75 = arith.mulf %74, %1 : vector<16x128xf32>
    %76 = arith.addf %72, %75 : vector<16x128xf32>
    %c3_36 = arith.constant 3 : index
    %c2_37 = arith.constant 2 : index
    %77 = memref.load %arg4[%c3_36, %c2_37] : memref<4x3xf32, #tpu.memory_space<smem>>
    %78 = vector.broadcast %77 : f32 to vector<16x128xf32>
    %79 = arith.mulf %78, %2 : vector<16x128xf32>
    %80 = arith.addf %76, %79 : vector<16x128xf32>
    %c3_38 = arith.constant 3 : index
    %81 = memref.load %arg5[%c3_38] : memref<4xf32, #tpu.memory_space<smem>>
    %82 = vector.broadcast %81 : f32 to vector<16x128xf32>
    %83 = arith.addf %80, %82 : vector<16x128xf32>
    %cst_39 = arith.constant 0.000000e+00 : f32
    %84 = vector.broadcast %cst_39 : f32 to vector<16x128xf32>
    %85 = arith.maximumf %83, %84 : vector<16x128xf32>
    %c3_40 = arith.constant 3 : index
    %c0_41 = arith.constant 0 : index
    %86 = vector.load %arg6[%c3_40, %c0_41] : memref<4x128xf32, #tpu.memory_space<vmem>>, vector<1x128xf32>
    %87 = vector.shape_cast %86 : vector<1x128xf32> to vector<128xf32>
    %88 = vector.shape_cast %87 : vector<128xf32> to vector<1x128xf32>
    %89 = vector.broadcast %88 : vector<1x128xf32> to vector<16x128xf32>
    %90 = arith.mulf %85, %89 : vector<16x128xf32>
    %91 = arith.addf %69, %90 : vector<16x128xf32>
    %cst_42 = arith.constant dense<0.000000e+00> : vector<16xf32>
    %92 = vector.multi_reduction <add>, %91, %cst_42 [1] : vector<16x128xf32> to vector<16xf32>
    %93 = vector.shape_cast %92 : vector<16xf32> to vector<16x1xf32>
    %c0_43 = arith.constant 0 : index
    %94 = memref.load %arg7[%c0_43] : memref<1xf32, #tpu.memory_space<smem>>
    %95 = vector.broadcast %94 : f32 to vector<16x1xf32>
    %96 = arith.addf %93, %95 : vector<16x1xf32>
    %c0_44 = arith.constant 0 : index
    %c0_45 = arith.constant 0 : index
    %97 = vector.load %arg8[%c0_44, %c0_45] : memref<16x1xf32, #tpu.memory_space<vmem>>, vector<16x1xf32>
    tpu.vector_store %arg8[%c0_44, %c0_45], %96 {strides = array<i32>} : memref<16x1xf32, #tpu.memory_space<vmem>>, vector<16x1xf32>,
    return
  }
  func.func @transform_0(%arg0: i32) -> (i32, i32) {
    %c0_i32 = arith.constant 0 : i32
    %c0_i32_0 = arith.constant 0 : i32
    return %arg0, %c0_i32 : i32, i32
  }
  func.func @transform_1(%arg0: i32) -> (i32, i32) {
    %c0_i32 = arith.constant 0 : i32
    %c0_i32_0 = arith.constant 0 : i32
    return %arg0, %c0_i32 : i32, i32
  }
  func.func @transform_2(%arg0: i32) -> (i32, i32) {
    %c0_i32 = arith.constant 0 : i32
    %c0_i32_0 = arith.constant 0 : i32
    return %arg0, %c0_i32 : i32, i32
  }
  func.func @transform_3(%arg0: i32) -> (i32, i32) {
    %c0_i32 = arith.constant 0 : i32
    %c0_i32_0 = arith.constant 0 : i32
    %c0_i32_1 = arith.constant 0 : i32
    return %c0_i32, %c0_i32_0 : i32, i32
  }
  func.func @transform_4(%arg0: i32) -> i32 {
    %c0_i32 = arith.constant 0 : i32
    %c0_i32_0 = arith.constant 0 : i32
    return %c0_i32 : i32
  }
  func.func @transform_5(%arg0: i32) -> (i32, i32) {
    %c0_i32 = arith.constant 0 : i32
    %c0_i32_0 = arith.constant 0 : i32
    %c0_i32_1 = arith.constant 0 : i32
    return %c0_i32, %c0_i32_0 : i32, i32
  }
  func.func @transform_6(%arg0: i32) -> i32 {
    %c0_i32 = arith.constant 0 : i32
    %c0_i32_0 = arith.constant 0 : i32
    return %c0_i32 : i32
  }
  func.func @transform_7(%arg0: i32) -> (i32, i32) {
    %c0_i32 = arith.constant 0 : i32
    %c0_i32_0 = arith.constant 0 : i32
    return %arg0, %c0_i32 : i32, i32
  }
}

</mosaic_0001>

<bundles_post_ra>
// kernel: _gather_and_score.1
= control target key start
LH: loop header
LB: loop body
LE: loop exit
PB: predicated region body
PF: predicated region fallthrough
CT: control target
= control target key end

     0   :  { %13 = vsyncpa [#allocation4], 0  ;;  %s391_s0 = inlined_call_operand.vmem [shape: f32[16,128], index: 0, kind: input, shape index: {}]   ;;  %s392_s1 = inlined_call_operand.vmem [shape: f32[16,128], index: 1, kind: input, shape index: {}]   ;;  %s393_s2 = inlined_call_operand.vmem [shape: f32[16,128], index: 2, kind: input, shape index: {}]   ;;  %s394_s3 = inlined_call_operand.vmem [shape: f32[4,3], index: 3, kind: input, shape index: {}]   ;;  %s395_s4 = inlined_call_operand.vmem [shape: f32[4], index: 4, kind: input, shape index: {}]   ;;  %s396_s5 = inlined_call_operand.vmem [shape: f32[4,128], index: 5, kind: input, shape index: {}]   ;;  %s397_s6 = inlined_call_operand.<no memory space> [shape: f32[1], index: 6, kind: input, shape index: {}]   ;;  %s398_s7 = inlined_call_operand.vmem [shape: f32[16,1], index: 7, kind: output, shape index: {}]  }
   0x1   :  { %s27_s26 = sshll.u32 %s394_s3, 4  ;;  %s28_s26 = int_to_ptr.vmem [resolvable:$true] %s27_s26 }
   0x2   :  { %14 = vsyncpa [#allocation6], 0  ;;  %s37_s29 = sshll.u32 %s395_s4, 4  ;;  %s219_s30 = scalar_lea.vmem %s28_s26, 64  ;;  %s38_s29 = int_to_ptr.vmem [resolvable:$true] %s37_s29 }
   0x3   :  { %p220_p0 = scmp.ne.s32.totalorder %s28_s26, %s219_s30  ;;  %p224_p1 = scmp.lt.s32.totalorder %s28_s26, %s28_s26 }
   0x4   :  { %p225_p2 = scmp.lt.s32.totalorder %s219_s30, %s219_s30 }
   0x6   :  { %p226_p3 = por %p225_p2, %p224_p1 }
   0x8   :  { %p227_p4 = pnand %p226_p3, %p220_p0 }
   0xa   :  { %230 = shalt.err (!%p227_p4)
}
   0xb   :  { %s247_s8 = smov [#allocation3]   ;;  %s231_s9 = scalar_lea.vmem %s38_s29, 16 }
   0xc   :  { %30 = dma.vmem_to_smem %s28_s26, 64, %s247_s8, [#allocation4]  }
   0xd   :  { %p232_p5 = scmp.ne.s32.totalorder %s38_s29, %s231_s9  ;;  %p236_p6 = scmp.lt.s32.totalorder %s38_s29, %s38_s29 }
   0xe   :  { %p237_p7 = scmp.lt.s32.totalorder %s231_s9, %s231_s9 }
  0x10   :  { %p238_p8 = por %p237_p7, %p236_p6 }
  0x12   :  { %p239_p9 = pnand %p238_p8, %p232_p5 }
  0x14   :  { %242 = shalt.err (!%p239_p9)
}
  0x15   :  { %s248_s3 = smov [#allocation5]  }
  0x16   :  { %40 = dma.vmem_to_smem %s38_s29, 16, %s248_s3, [#allocation6]  }
  0x17   :  { %243 = dma.done.wait [#allocation4], 64  }
  0x18   :  { %244 = vsyncadd [#allocation4], 4294967232 }
  0x19   :  { %245 = dma.done.wait [#allocation6], 16  }
  0x1a   :  { %246 = vsyncadd [#allocation6], 4294967280 }
  0x1b   :  { %51 = sfence }
  0x1c   :  { %s58_s4 = sld [smem:[#allocation3]]  ;;  %s295_s10 = sld [smem:[#allocation3 + $0x1]]  ;;  %v52_v0 = vld [vmem:[%s391_s0] sm:$0xff]  ;;  %v327_v3 = vld [vmem:[%s391_s0 + $0x8] sm:$0xff]  ;;  %vm190_vm0 = vcmask 7168  }
  0x1d   :  { %s297_s11 = sld [smem:[#allocation3 + $0x2]]  ;;  %s299_s12 = sld [smem:[#allocation5]]  ;;  %v54_v1 = vld [vmem:[%s392_s1] sm:$0xff]  ;;  %v336_v5 = vld [vmem:[%s392_s1 + $0x8] sm:$0xff] }
  0x1e   :  { %s301_s13 = sld [smem:[#allocation3 + $0x80]]  ;;  %s303_s14 = sld [smem:[#allocation3 + $0x81]]  ;;  %v56_v2 = vld [vmem:[%s393_s2] sm:$0xff]  ;;  %v57_v30 = vld [vmem:[%s393_s2 + $0x8] sm:$0xff] }
  0x1f   :  { %s305_s15 = sld [smem:[#allocation3 + $0x82]]  ;;  %s313_s20 = sld [smem:[#allocation5 + $0x1]]  ;;  %v201_v39 = vld [vmem:[%s396_s5] ss:$0 sm:$0xff]  ;;  %v206_v48 = vld [vmem:[%s396_s5 + $0x1] ss:$0 sm:$0xff] }
  0x20   :  { %s315_s21 = sld [smem:[#allocation3 + $0x100]]  ;;  %s320_s24 = sld [smem:[#allocation3 + $0x101]]  ;;  %v211_v57 = vld [vmem:[%s396_s5 + $0x2] ss:$0 sm:$0xff] }
  0x21   :  { %s322_s25 = sld [smem:[#allocation3 + $0x102]]  ;;  %s331_s29 = sld [smem:[#allocation3 + $0x180]] }
  0x22   :  { %v59_v4 = vstv %s58_s4  ;;  %s329_s28 = sld [smem:[#allocation5 + $0x2]]  ;;  %v63_v7 = vstv %s295_s10  ;;  %s340_s9 = sld [smem:[#allocation3 + $0x181]] }
  0x23   :  { %v60_v6 = vmul.f32 %v59_v4, %v52_v0  ;;  %v69_v8 = vstv %s297_s11  ;;  %s342_s0 = sld [smem:[#allocation3 + $0x182]]  ;;  %v61_v9 = vmul.f32 %v59_v4, %v327_v3  ;;  %v64_v10 = vmul.f32 %v63_v7, %v54_v1  ;;  %s347_s3 = sld [smem:[#allocation5 + $0x3]] }
  0x24   :  { %v70_v11 = vmul.f32 %v69_v8, %v56_v2  ;;  %v75_v12 = vstv %s299_s12  ;;  %v90_v13 = vstv %s301_s13  ;;  %v94_v15 = vstv %s303_s14 }
  0x25   :  { %v91_v14 = vmul.f32 %v90_v13, %v52_v0  ;;  %v100_v16 = vstv %s305_s15  ;;  %v65_v17 = vmul.f32 %v63_v7, %v336_v5  ;;  %v66_v18 = vadd.f32 %v64_v10, %v60_v6  ;;  %v216_v10 = vld [vmem:[%s396_s5 + $0x3] ss:$0 sm:$0xff] }
  0x26   :  { %v95_v19 = vmul.f32 %v94_v15, %v54_v1  ;;  %v101_v20 = vmul.f32 %v100_v16, %v56_v2  ;;  %v106_v21 = vstv %s313_s20  ;;  %v121_v22 = vstv %s315_s21 }
  0x27   :  { %v125_v23 = vstv %s320_s24  ;;  %v131_v24 = vstv %s322_s25  ;;  %v67_v25 = vadd.f32 %v65_v17, %v61_v9  ;;  %v72_v26 = vadd.f32 %v70_v11, %v66_v18 }
  0x28   :  { %v97_v27 = vadd.f32 %v95_v19, %v91_v14  ;;  %v122_v28 = vmul.f32 %v121_v22, %v52_v0  ;;  %v126_v29 = vmul.f32 %v125_v23, %v54_v1  ;;  %v132_v31 = vmul.f32 %v131_v24, %v56_v2 }
  0x29   :  { %v137_v32 = vstv %s329_s28  ;;  %v152_v33 = vstv %s331_s29  ;;  %v156_v34 = vstv %s340_s9  ;;  %v76_v35 = vadd.f32 %v75_v12, %v72_v26 }
  0x2a   :  { %v103_v36 = vadd.f32 %v101_v20, %v97_v27  ;;  %v128_v37 = vadd.f32 %v126_v29, %v122_v28  ;;  %v153_v38 = vmul.f32 %v152_v33, %v52_v0  ;;  %v157_v40 = vmul.f32 %v156_v34, %v54_v1 }
  0x2b   :  { %v162_v41 = vstv %s342_s0  ;;  %v168_v42 = vstv %s347_s3  ;;  %v71_v43 = vmul.f32 %v69_v8, %v57_v30  ;;  %v78_v44 = vmax.f32 %v76_v35, 0.0 }
  0x2c   :  { %v107_v45 = vadd.f32 %v106_v21, %v103_v36  ;;  %v134_v46 = vadd.f32 %v132_v31, %v128_v37  ;;  %v163_v47 = vmul.f32 %v162_v41, %v56_v2  ;;  %v159_v49 = vadd.f32 %v157_v40, %v153_v38 }
  0x2d   :  { %v73_v50 = vadd.f32 %v71_v43, %v67_v25  ;;  %v92_v51 = vmul.f32 %v90_v13, %v327_v3  ;;  %v96_v52 = vmul.f32 %v94_v15, %v336_v5  ;;  %v85_v53 = vmul.f32 %v201_v39, %v78_v44 }
  0x2e   :  { %v109_v54 = vmax.f32 %v107_v45, 0.0  ;;  %v138_v55 = vadd.f32 %v137_v32, %v134_v46  ;;  %v102_v56 = vmul.f32 %v100_v16, %v57_v30  ;;  %v165_v58 = vadd.f32 %v163_v47, %v159_v49 }
  0x2f   :  { %v77_v59 = vadd.f32 %v75_v12, %v73_v50  ;;  %v98_v60 = vadd.f32 %v96_v52, %v92_v51  ;;  %v123_v61 = vmul.f32 %v121_v22, %v327_v3  ;;  %v127_v0 = vmul.f32 %v125_v23, %v336_v5 }
  0x30   :  { %v116_v62 = vmul.f32 %v206_v48, %v109_v54  ;;  %v140_v63 = vmax.f32 %v138_v55, 0.0  ;;  %v133_v1 = vmul.f32 %v131_v24, %v57_v30  ;;  %v169_v2 = vadd.f32 %v168_v42, %v165_v58 }
  0x31   :  { %v79_v4 = vmax.f32 %v77_v59, 0.0  ;;  %v104_v6 = vadd.f32 %v102_v56, %v98_v60  ;;  %v154_v7 = vmul.f32 %v152_v33, %v327_v3  ;;  %v129_v11 = vadd.f32 %v127_v0, %v123_v61 }
  0x32   :  { %v118_v8 = vadd.f32 %v116_v62, %v85_v53  ;;  %v147_v9 = vmul.f32 %v211_v57, %v140_v63  ;;  %v158_v12 = vmul.f32 %v156_v34, %v336_v5  ;;  %v171_v13 = vmax.f32 %v169_v2, 0.0 }
  0x33   :  { %v108_v14 = vadd.f32 %v106_v21, %v104_v6  ;;  %v164_v15 = vmul.f32 %v162_v41, %v57_v30  ;;  %v135_v17 = vadd.f32 %v133_v1, %v129_v11  ;;  %v86_v20 = vmul.f32 %v201_v39, %v79_v4 }
  0x34   :  { %v149_v16 = vadd.f32 %v147_v9, %v118_v8  ;;  %v160_v18 = vadd.f32 %v158_v12, %v154_v7  ;;  %v178_v19 = vmul.f32 %v216_v10, %v171_v13  ;;  %v187_v30 = vstv %s397_s6 }
  0x35   :  { %v110_v22 = vmax.f32 %v108_v14, 0.0  ;;  %v139_v23 = vadd.f32 %v137_v32, %v135_v17 }
  0x36   :  { %v166_v3 = vadd.f32 %v164_v15, %v160_v18  ;;  %v180_v24 = vadd.f32 %v178_v19, %v149_v16 }
  0x37   :  { %v117_v25 = vmul.f32 %v206_v48, %v110_v22  ;;  %v141_v26 = vmax.f32 %v139_v23, 0.0 }
  0x38   :  { %v170_v27 = vadd.f32 %v168_v42, %v166_v3  ;;  %182 = vadd.xlane.f32.xlu0 %v180_v24 }
  0x39   :  { %v119_v28 = vadd.f32 %v117_v25, %v86_v20  ;;  %v148_v29 = vmul.f32 %v211_v57, %v141_v26 }
  0x3a   :  { %v172_v31 = vmax.f32 %v170_v27, 0.0 }
  0x3b   :  { %v150_v5 = vadd.f32 %v148_v29, %v119_v28 }
  0x3c   :  { %v179_v33 = vmul.f32 %v216_v10, %v172_v31 }
  0x3e   :  { %v181_v21 = vadd.f32 %v179_v33, %v150_v5 }
  0x40   :  { %184 = vadd.xlane.f32.xlu0 %v181_v21 }
  0xc5   :  { %v183_v34 = vpop.xlane.xlu0 %182 }
  0xc6   :  { %v188_v32 = vadd.f32 %v187_v30, %v183_v34 }
  0xc8   :  { %191 = vst.msk [vmem:[%s398_s7] sm:$0xff] %vm190_vm0, %v188_v32 }
  0xcd   :  { %v185_v35 = vpop.xlane.xlu0 %184 }
  0xce   :  { %v189_v36 = vadd.f32 %v187_v30, %v185_v35 }
  0xd0   :  { %192 = vst.msk [vmem:[%s398_s7 + $0x8] sm:$0xff] %vm190_vm0, %v189_v36 }
  0xd1   :  { %197 = vsyncpa [#allocation4], 1 }
  0xd2   :  { %198 = vsyncpa [#allocation6], 1 }

</bundles_post_ra>
